<compile_context>
chip_gen: v5e
topology: v5e:2x2
jax: 0.10.0
libtpu: 0.0.40
codegen_flags: <defaults>
</compile_context>

<pallas_src>
import jax
import jax.numpy as jnp
from jax.experimental import pallas as pl
from jax.experimental.pallas import tpu as pltpu

CATEGORY_NUM = 10
HIDDEN_SIZE = 32    # stand-in for AutoConfig.hidden_size (e.g. 768 for BERT)
FC_DIM = 64
C_PAD = 128         # lane-dense padded logit width (multiple of 128)
MAX_TB = 512        # max batch-tile rows per grid step


def _round_up(x, m):
    return (x + m - 1) // m * m


def _mlp_head_kernel(embed_ref, w1_ref, w2_ref, w3_ref, out_ref):
    x = embed_ref[...]                                                      # [TB, H]  f32
    h1 = jnp.maximum(
        jnp.dot(x, w1_ref[...], preferred_element_type=jnp.float32), 0.0)   # [TB, 64]
    h2 = jnp.maximum(
        jnp.dot(h1, w2_ref[...], preferred_element_type=jnp.float32), 0.0)  # [TB, 64]
    out_ref[...] = jnp.dot(
        h2, w3_ref[...], preferred_element_type=jnp.float32)                # [TB, C_PAD]


def prepare_head_params(w1, w2, w3):
    """One-time (model-load) weight prep.

    w1: [64, H], w2: [64, 64], w3: [C, 64] in PyTorch [out, in] layout.
    Returns [in, out]-layout weights with W3 zero-padded to a lane-dense
    [64, C_PAD] so the kernel's final store is unmasked.
    """
    w1_t = jnp.transpose(w1).astype(jnp.float32)                 # [H, 64]
    w2_t = jnp.transpose(w2).astype(jnp.float32)                 # [64, 64]
    w3_t = jnp.transpose(w3).astype(jnp.float32)                 # [64, C]
    c = w3_t.shape[1]
    w3_tp = jnp.pad(w3_t, ((0, 0), (0, C_PAD - c)))              # [64, C_PAD]
    return w1_t, w2_t, w3_tp


def base_model_head(embed, w1_t, w2_t, w3_tp):
    """embed: [B, H] pooled embedding; weights from prepare_head_params."""
    B, H = embed.shape

    # Batch tile: multiple of 8 (f32 sublane), capped at MAX_TB so big
    # batches still pipeline across grid steps / both v7x TensorCores.
    TB = MAX_TB if B >= MAX_TB else _round_up(B, 8)
    Bp = _round_up(B, TB)
    if Bp != B:
        embed = jnp.pad(embed, ((0, Bp - B), (0, 0)))

    grid = (Bp // TB,)

    out_padded = pl.pallas_call(
        _mlp_head_kernel,
        out_shape=jax.ShapeDtypeStruct((Bp, C_PAD), jnp.float32),
        grid=grid,
        in_specs=[
            pl.BlockSpec((TB, H), lambda i: (i, 0)),           # batch-tiled input
            pl.BlockSpec((H, FC_DIM), lambda i: (0, 0)),       # resident weights
            pl.BlockSpec((FC_DIM, FC_DIM), lambda i: (0, 0)),
            pl.BlockSpec((FC_DIM, C_PAD), lambda i: (0, 0)),
        ],
        out_specs=pl.BlockSpec((TB, C_PAD), lambda i: (i, 0)),
        compiler_params=pltpu.CompilerParams(
            dimension_semantics=("parallel",)),                 # megacore sharding
    )(embed, w1_t, w2_t, w3_tp)

    # Strip batch padding and lane-dense logit padding outside the kernel.
    return out_padded[:B, :CATEGORY_NUM]


def _reference(embed, w1, w2, w3):
    h1 = jnp.maximum(embed @ w1.T, 0.0)
    h2 = jnp.maximum(h1 @ w2.T, 0.0)
    return h2 @ w3.T


if __name__ == "__main__":
    key = jax.random.PRNGKey(0)
    k_embed, k_w1, k_w2, k_w3 = jax.random.split(key, 4)

    B = 8
    # Deterministic synthetic "pooler_output" and Linear weights (PyTorch [out, in]).
    embed = jax.random.normal(k_embed, (B, HIDDEN_SIZE), dtype=jnp.float32)
    w1 = jax.random.normal(k_w1, (FC_DIM, HIDDEN_SIZE), dtype=jnp.float32) * (1.0 / HIDDEN_SIZE ** 0.5)
    w2 = jax.random.normal(k_w2, (FC_DIM, FC_DIM), dtype=jnp.float32) * (1.0 / FC_DIM ** 0.5)
    w3 = jax.random.normal(k_w3, (CATEGORY_NUM, FC_DIM), dtype=jnp.float32) * (1.0 / FC_DIM ** 0.5)

    # One-time weight prep (model-load time); not on the per-call critical path.
    w1_t, w2_t, w3_tp = prepare_head_params(w1, w2, w3)

    head = jax.jit(base_model_head)
    out = head(embed, w1_t, w2_t, w3_tp)
    out = jax.block_until_ready(out)

    ref = _reference(embed, w1, w2, w3)
    assert out.shape == (B, CATEGORY_NUM), out.shape
    assert jnp.allclose(out, ref, atol=1e-4, rtol=1e-4), "mismatch vs reference"

    print("KERNEL_OK")
</pallas_src>

<mosaic_0001>
module attributes {stable_mosaic.version = 11 : i64} {
  func.func @_mlp_head_kernel(%arg0: i32, %arg1: memref<8x32xf32, #tpu.memory_space<vmem>>, %arg2: memref<32x64xf32, #tpu.memory_space<vmem>>, %arg3: memref<64x64xf32, #tpu.memory_space<vmem>>, %arg4: memref<64x128xf32, #tpu.memory_space<vmem>>, %arg5: memref<8x128xf32, #tpu.memory_space<vmem>>) attributes {dimension_semantics = [#tpu.dimension_semantics<parallel>], iteration_bounds = array<i64: 1>, scalar_prefetch = 0 : i64, scratch_operands = 0 : i64, tpu.core_type = #tpu.core_type<tc>, window_params = [{transform_indices = @transform_0, window_bounds = array<i64: 8, 32>}, {pipeline_mode = #tpu.pipeline_mode<synchronous>, transform_indices = @transform_1, window_bounds = array<i64: 32, 64>}, {pipeline_mode = #tpu.pipeline_mode<synchronous>, transform_indices = @transform_2, window_bounds = array<i64: 64, 64>}, {pipeline_mode = #tpu.pipeline_mode<synchronous>, transform_indices = @transform_3, window_bounds = array<i64: 64, 128>}, {transform_indices = @transform_4, window_bounds = array<i64: 8, 128>}]} {
    %c0 = arith.constant 0 : index
    %c0_0 = arith.constant 0 : index
    %0 = vector.load %arg1[%c0, %c0_0] : memref<8x32xf32, #tpu.memory_space<vmem>>, vector<8x32xf32>
    %c0_1 = arith.constant 0 : index
    %c0_2 = arith.constant 0 : index
    %1 = vector.load %arg2[%c0_1, %c0_2] : memref<32x64xf32, #tpu.memory_space<vmem>>, vector<32x64xf32>
    %cst = arith.constant dense<0.000000e+00> : vector<8x64xf32>
    %2 = tpu.matmul %0, %1, %cst {dimension_numbers = #tpu.dot_dimension_numbers<[1], [0], [0], [1], [0, 0, 1, 1], [], []>} : vector<8x32xf32>, vector<32x64xf32>, vector<8x64xf32> -> vector<8x64xf32>
    %cst_3 = arith.constant 0.000000e+00 : f32
    %3 = vector.broadcast %cst_3 : f32 to vector<8x64xf32>
    %4 = arith.maximumf %2, %3 : vector<8x64xf32>
    %c0_4 = arith.constant 0 : index
    %c0_5 = arith.constant 0 : index
    %5 = vector.load %arg3[%c0_4, %c0_5] : memref<64x64xf32, #tpu.memory_space<vmem>>, vector<64x64xf32>
    %cst_6 = arith.constant dense<0.000000e+00> : vector<8x64xf32>
    %6 = tpu.matmul %4, %5, %cst_6 {dimension_numbers = #tpu.dot_dimension_numbers<[1], [0], [0], [1], [0, 0, 1, 1], [], []>} : vector<8x64xf32>, vector<64x64xf32>, vector<8x64xf32> -> vector<8x64xf32>
    %cst_7 = arith.constant 0.000000e+00 : f32
    %7 = vector.broadcast %cst_7 : f32 to vector<8x64xf32>
    %8 = arith.maximumf %6, %7 : vector<8x64xf32>
    %c0_8 = arith.constant 0 : index
    %c0_9 = arith.constant 0 : index
    %9 = vector.load %arg4[%c0_8, %c0_9] : memref<64x128xf32, #tpu.memory_space<vmem>>, vector<64x128xf32>
    %cst_10 = arith.constant dense<0.000000e+00> : vector<8x128xf32>
    %10 = tpu.matmul %8, %9, %cst_10 {dimension_numbers = #tpu.dot_dimension_numbers<[1], [0], [0], [1], [0, 0, 1, 1], [], []>} : vector<8x64xf32>, vector<64x128xf32>, vector<8x128xf32> -> vector<8x128xf32>
    %c0_11 = arith.constant 0 : index
    %c0_12 = arith.constant 0 : index
    %11 = vector.load %arg5[%c0_11, %c0_12] : memref<8x128xf32, #tpu.memory_space<vmem>>, vector<8x128xf32>
    tpu.vector_store %arg5[%c0_11, %c0_12], %10 {strides = array<i32>} : memref<8x128xf32, #tpu.memory_space<vmem>>, vector<8x128xf32>,
    return
  }
  func.func @transform_0(%arg0: i32) -> (i32, i32) {
    %c0_i32 = arith.constant 0 : i32
    %c0_i32_0 = arith.constant 0 : i32
    return %arg0, %c0_i32 : i32, i32
  }
  func.func @transform_1(%arg0: i32) -> (i32, i32) {
    %c0_i32 = arith.constant 0 : i32
    %c0_i32_0 = arith.constant 0 : i32
    %c0_i32_1 = arith.constant 0 : i32
    return %c0_i32, %c0_i32_0 : i32, i32
  }
  func.func @transform_2(%arg0: i32) -> (i32, i32) {
    %c0_i32 = arith.constant 0 : i32
    %c0_i32_0 = arith.constant 0 : i32
    %c0_i32_1 = arith.constant 0 : i32
    return %c0_i32, %c0_i32_0 : i32, i32
  }
  func.func @transform_3(%arg0: i32) -> (i32, i32) {
    %c0_i32 = arith.constant 0 : i32
    %c0_i32_0 = arith.constant 0 : i32
    %c0_i32_1 = arith.constant 0 : i32
    return %c0_i32, %c0_i32_0 : i32, i32
  }
  func.func @transform_4(%arg0: i32) -> (i32, i32) {
    %c0_i32 = arith.constant 0 : i32
    %c0_i32_0 = arith.constant 0 : i32
    return %arg0, %c0_i32 : i32, i32
  }
}

</mosaic_0001>

<bundles_post_ra>
// kernel: base_model_head.1
= control target key start
LH: loop header
LB: loop body
LE: loop exit
PB: predicated region body
PF: predicated region fallthrough
CT: control target
= control target key end

     0   :  { %9 = vsyncpa [#allocation3], 0  ;;  %s378_s0 = inlined_call_operand.hbm [shape: f32[8,32], index: 0, kind: input, shape index: {}]   ;;  %s379_s1 = inlined_call_operand.hbm [shape: f32[32,64], index: 1, kind: input, shape index: {}]   ;;  %s380_s2 = inlined_call_operand.hbm [shape: f32[64,64], index: 2, kind: input, shape index: {}]   ;;  %s381_s3 = inlined_call_operand.hbm [shape: f32[64,128], index: 3, kind: input, shape index: {}]   ;;  %s382_s4 = inlined_call_operand.hbm [shape: f32[8,128], index: 4, kind: output, shape index: {}]  }
   0x1   :  { %10 = vsyncpa [#allocation6], 0 }
   0x2   :  { %11 = vsyncpa [#allocation9], 0  ;;  %s28_s17 = sshll.u32 %s379_s1, 4  ;;  %s29_s17 = int_to_ptr.hbm [resolvable:$true] %s28_s17 }
   0x3   :  { %12 = vsyncpa [#allocation4], 0  ;;  %s331_s18 = smov [#allocation5]   ;;  %s18_s22 = sshll.u32 %s378_s0, 4  ;;  %s19_s22 = int_to_ptr.hbm [resolvable:$true] %s18_s22 }
   0x4   :  { %s30_s19 = sshll.u32 %s331_s18, 4  ;;  %s332_s23 = smov 128   ;;  %s31_s19 = int_to_ptr.vmem [resolvable:$true] %s30_s19 }
   0x5   :  { %s333_s24 = smov 8   ;;  %s334_s25 = smov [#allocation2]  }
   0x6   :  { %36 = dma.hbm_to_vmem [thread:$0]  %s29_s17, 512, %s31_s19, [#allocation6], %s332_s23, %s332_s23, %s333_s24  }
   0x7   :  { %s20_s26 = sshll.u32 %s334_s25, 4  ;;  %s41_s29 = sshll.u32 %s380_s2, 4  ;;  %s21_s26 = int_to_ptr.vmem [resolvable:$true] %s20_s26  ;;  %s42_s29 = int_to_ptr.hbm [resolvable:$true] %s41_s29 }
   0x8   :  { %23 = dma.hbm_to_vmem [thread:$0]  %s19_s22, 128, %s21_s26, [#allocation3]  }
   0x9   :  { %s54_s5 = sshll.u32 %s381_s3, 4  ;;  %s335_s6 = smov [#allocation7]   ;;  %s55_s5 = int_to_ptr.hbm [resolvable:$true] %s54_s5 }
   0xa   :  { %s43_s7 = sshll.u32 %s335_s6, 4  ;;  %s336_s0 = smov [#allocation8]   ;;  %s44_s7 = int_to_ptr.vmem [resolvable:$true] %s43_s7 }
   0xb   :  { %49 = dma.hbm_to_vmem [thread:$0]  %s42_s29, 1024, %s44_s7, [#allocation6], %s332_s23, %s332_s23, %s333_s24  }
   0xc   :  { %s56_s8 = sshll.u32 %s336_s0, 4  ;;  %s57_s8 = int_to_ptr.vmem [resolvable:$true] %s56_s8 }
   0xd   :  { %62 = dma.hbm_to_vmem [thread:$0]  %s55_s5, 1024, %s57_s8, [#allocation9], %s332_s23, %s332_s23, %s333_s24  }
   0xe   :  { %323 = dma.done.wait [#allocation3], 128  }
   0xf   :  { %324 = vsyncadd [#allocation3], 4294967168 }
  0x10   :  { %325 = dma.done.wait [#allocation6], 1536  }
  0x11   :  { %326 = vsyncadd [#allocation6], 4294965760 }
  0x12   :  { %327 = dma.done.wait [#allocation9], 1024  }
  0x13   :  { %328 = vsyncadd [#allocation9], 4294966272  ;;  %v83_v0 = vld [vmem:[#allocation5 + $0x18] sm:$0xff]  ;;  %v82_v1 = vld [vmem:[#allocation5 + $0x10] sm:$0xff]  ;;  %vm84_vm0 = vcmask 261120   ;;  %vm117_vm1 = vcmask 523264  }
  0x14   :  { %100 = vmatpush.msra.mxu0 %v83_v0  ;;  %v116_v2 = vld [vmem:[#allocation7 + $0x38] sm:$0xff]  ;;  %v81_v3 = vld [vmem:[#allocation5 + $0x8] sm:$0xff]  ;;  %v115_v4 = vld [vmem:[#allocation7 + $0x30] sm:$0xff]  ;;  %s337_s2 = smov [#allocation10]   ;;  %s181_s11 = sshll.u32 %s382_s4, 4  ;;  %s182_s11 = int_to_ptr.hbm [resolvable:$true] %s181_s11 }
  0x15   :  { %129 = vmatpush.msra.mxu1 %v116_v2  ;;  %v114_v5 = vld [vmem:[#allocation7 + $0x28] sm:$0xff]  ;;  %v80_v6 = vld [vmem:[#allocation5] sm:$0xff]  ;;  %v79_v7 = vld [vmem:[#allocation2] sm:$0xff]  ;;  %s179_s3 = sshll.u32 %s337_s2, 4  ;;  %s180_s3 = int_to_ptr.vmem [resolvable:$true] %s179_s3 }
  0x16   :  { %101 = vmatpush.msra.mxu0 %v82_v1  ;;  %v113_v8 = vld [vmem:[#allocation7 + $0x20] sm:$0xff]  ;;  %v112_v9 = vld [vmem:[#allocation7 + $0x18] sm:$0xff]  ;;  %v111_v10 = vld [vmem:[#allocation7 + $0x10] sm:$0xff] }
  0x17   :  { %130 = vmatpush.msra.mxu1 %v115_v4  ;;  %v110_v11 = vld [vmem:[#allocation7 + $0x8] sm:$0xff]  ;;  %v109_v12 = vld [vmem:[#allocation7] sm:$0xff]  ;;  %v149_v13 = vld [vmem:[#allocation8 + $0x38] sm:$0xff] }
  0x18   :  { %102 = vmatpush.msra.mxu0 %v81_v3  ;;  %v148_v14 = vld [vmem:[#allocation8 + $0x30] sm:$0xff]  ;;  %161 = vmatpush.msra.mxu2 %v149_v13  ;;  %v147_v15 = vld [vmem:[#allocation8 + $0x28] sm:$0xff]  ;;  %v146_v16 = vld [vmem:[#allocation8 + $0x20] sm:$0xff] }
  0x19   :  { %131 = vmatpush.msra.mxu1 %v114_v5  ;;  %v145_v17 = vld [vmem:[#allocation8 + $0x18] sm:$0xff]  ;;  %v144_v18 = vld [vmem:[#allocation8 + $0x10] sm:$0xff]  ;;  %v143_v21 = vld [vmem:[#allocation8 + $0x8] sm:$0xff] }
  0x1a   :  { %103 = vmatpush.msra.mxu0 %v80_v6  ;;  %162 = vmatpush.msra.mxu2 %v148_v14  ;;  %v142_v22 = vld [vmem:[#allocation8] sm:$0xff] }
  0x1b   :  { %193 = vmatmul.msk.f32.vlgmr.msra.gmra.mxu0 %vm84_vm0, %v79_v7  ;;  %132 = vmatpush.msra.mxu1 %v113_v8 }
  0x1c   :  { %163 = vmatpush.msra.mxu2 %v147_v15 }
  0x1d   :  { %133 = vmatpush.msra.mxu1 %v112_v9 }
  0x1e   :  { %164 = vmatpush.msra.mxu2 %v146_v16 }
  0x1f   :  { %134 = vmatpush.msra.mxu1 %v111_v10 }
  0x20   :  { %165 = vmatpush.msra.mxu2 %v145_v17 }
  0x21   :  { %135 = vmatpush.msra.mxu1 %v110_v11 }
  0x22   :  { %166 = vmatpush.msra.mxu2 %v144_v18 }
  0x23   :  { %136 = vmatpush.msra.mxu1 %v109_v12 }
  0x24   :  { %167 = vmatpush.msra.mxu2 %v143_v21 }
  0x26   :  { %168 = vmatpush.msra.mxu2 %v142_v22 }
  0x98   :  { %v105_v19 = vpop.f32.mrf.mxu0 }
  0x99   :  { %v108_v20 = vmax.f32 %v105_v19, 0.0 }
  0x9b   :  { %194 = vmatmul.msk.f32.vlgmr.msra.gmra.mxu1 %vm117_vm1, %v108_v20 }
 0x118   :  { %v138_v23 = vpop.f32.mrf.mxu1 }
 0x119   :  { %v141_v24 = vmax.f32 %v138_v23, 0.0 }
 0x11b   :  { %195 = vmatmul.msk.f32.vlgmr.msra.gmra.mxu2 %vm117_vm1, %v141_v24 }
 0x19e   :  { %v170_v25 = vpop.f32.mrf.mxu2 }
 0x19f   :  { %173 = vst [vmem:[#allocation10] sm:$0xff] %v170_v25 }
 0x1a0   :  { %184 = dma.vmem_to_hbm [thread:$0]  %s180_s3, 128, %s182_s11, [#allocation4]  }
 0x1a1   :  { %329 = dma.done.wait [#allocation4], 128  }
 0x1a2   :  { %330 = vsyncadd [#allocation4], 4294967168 }
 0x1a3   :  { %189 = vsyncpa [#allocation3], 1 }
 0x1a4   :  { %190 = vsyncpa [#allocation6], 1 }
 0x1a5   :  { %191 = vsyncpa [#allocation9], 1 }
 0x1a6   :  { %192 = vsyncpa [#allocation4], 1 }

</bundles_post_ra>
